<compile_context>
chip_gen: v6e
topology: v6e:2x2x1
jax: 0.10.0
libtpu: 0.0.40
codegen_flags: <defaults>
</compile_context>

<pallas_src>
import math
from functools import partial

import jax
import jax.numpy as jnp
from jax import lax
from jax.experimental import pallas as pl
from jax.experimental.pallas import tpu as pltpu

LANE = 128       # vreg lane width
SUBLANE = 8      # vreg sublane count
MASK_NEG = -1e30 # additive mask for non-logit lanes (finite: exp underflows to 0)


def _round_up(n, m):
    return (n + m - 1) // m * m


# ---------------------------------------------------------------------------
# Phase 1: batched (non-recurrent) input projection  px = x @ Wx + b.
# Runs over all T*Bp rows at once so the MXU sees a large M instead of an
# 8-row matmul per timestep on the serial recurrence path.
# ---------------------------------------------------------------------------
def _proj_kernel(x_ref, wx_ref, b_ref, px_ref):
    px_ref[...] = (jnp.dot(x_ref[...], wx_ref[...],
                           preferred_element_type=jnp.float32)
                   + b_ref[...])


# ---------------------------------------------------------------------------
# Phase 2: serial recurrence over time chunks.
#   per step: z = px[t] + h @ Wh ; out[t] = log_softmax(logit lanes of z); h = z
# ---------------------------------------------------------------------------
def _make_recurrent_kernel(time_chunk, seq_len):
    Tt = time_chunk
    guard_tail = (seq_len % Tt) != 0   # only a ragged tail chunk needs the guard

    def kernel(px_ref, wh_ref, mask_ref, h0_ref, out_ref, hlast_ref):
        c = pl.program_id(0)

        # hlast_ref has a constant index_map: its block stays VMEM-resident
        # across the whole serial grid and acts as the hidden-state carry
        # (accumulator pattern); HBM writeback happens once at grid end.
        # Do not change its index_map without re-adding a scratch carry.
        @pl.when(c == 0)
        def _():
            hlast_ref[...] = h0_ref[...]

        wh = wh_ref[...]       # (LANE, LANE); rows >= H are exactly zero
        mask = mask_ref[...]   # (1, LANE): 0 on lanes [H, H+O), -1e30 elsewhere

        def step(i, h):
            # Fused i2h/i2o: lanes [0,H) = new hidden, lanes [H,H+O) = logits.
            # The input half (x @ Wx + b) was hoisted to phase 1; only h @ Wh
            # remains on the serial critical path.
            z = px_ref[i] + jnp.dot(h, wh, preferred_element_type=jnp.float32)

            # Log-softmax restricted to the logit lanes via the additive mask;
            # exp(-1e30 - m) underflows to exactly 0, so no second select.
            masked = z + mask
            m = jnp.max(masked, axis=-1, keepdims=True)
            lse = jnp.log(jnp.sum(jnp.exp(masked - m), axis=-1, keepdims=True))
            # Lanes outside [H, H+O) hold junk; the wrapper slices them off.
            out_ref[i] = masked - (m + lse)

            if guard_tail:
                # Freeze the hidden on padded timesteps (t >= seq_len).
                t = c * Tt + i
                z = jnp.where(t < seq_len, z, h)
            return z

        hlast_ref[...] = lax.fori_loop(0, Tt, step, hlast_ref[...], unroll=True)

    return kernel


@partial(jax.jit, static_argnames=("hidden_size", "output_size", "time_chunk"))
def rnn_forward_seq(xs, h0, wx, wh, b, *, hidden_size, output_size, time_chunk=8):
    """Run the RNN over a whole sequence with two Pallas phases.

    xs: (T, B, I) f32, h0: (B, H) f32
    wx: (I, 128), wh: (128, 128) (rows >= H zero), b: (1, 128)
    Returns (log_probs (T, B, O), h_final (B, H)).
    """
    T, B, I = xs.shape
    H, O = hidden_size, output_size
    Bp = _round_up(max(B, SUBLANE), SUBLANE)   # sublane-pad the batch
    Tt = max(1, min(time_chunk, T))            # timesteps per grid iteration
    Tc = pl.cdiv(T, Tt)                        # number of time chunks
    Tp = Tc * Tt                               # chunk-padded sequence length

    xs_p = jnp.pad(xs, ((0, Tp - T), (0, Bp - B), (0, 0)))
    h0_p = jnp.pad(h0, ((0, Bp - B), (0, LANE - H)))

    # Additive log-softmax mask (resident (1,128) VMEM input).
    lanes = jnp.arange(LANE)
    mask = jnp.where((lanes >= H) & (lanes < H + O), 0.0, MASK_NEG)
    mask = mask.astype(jnp.float32)[None, :]

    # ---- Phase 1: batched input projection over all Tp*Bp rows ----
    RT = Tt * Bp
    px = pl.pallas_call(
        _proj_kernel,
        out_shape=jax.ShapeDtypeStruct((Tp * Bp, LANE), jnp.float32),
        grid_spec=pltpu.PrefetchScalarGridSpec(
            num_scalar_prefetch=0,
            grid=(Tc,),
            in_specs=[
                pl.BlockSpec((RT, I), lambda r: (r, 0)),       # x rows
                pl.BlockSpec((I, LANE), lambda r: (0, 0)),     # Wx, resident
                pl.BlockSpec((1, LANE), lambda r: (0, 0)),     # fused bias, resident
            ],
            out_specs=pl.BlockSpec((RT, LANE), lambda r: (r, 0)),
        ),
        compiler_params=pltpu.CompilerParams(
            dimension_semantics=("parallel",)),
    )(xs_p.reshape(Tp * Bp, I), wx, b)
    px = px.reshape(Tp, Bp, LANE)

    # ---- Phase 2: serial recurrence, Tt steps per grid iteration ----
    kernel = _make_recurrent_kernel(Tt, T)
    out_p, hlast_p = pl.pallas_call(
        kernel,
        out_shape=(
            jax.ShapeDtypeStruct((Tp, Bp, LANE), jnp.float32),  # lane-dense log-prob slab
            jax.ShapeDtypeStruct((Bp, LANE), jnp.float32),      # final hidden (padded)
        ),
        grid_spec=pltpu.PrefetchScalarGridSpec(
            num_scalar_prefetch=0,
            grid=(Tc,),
            in_specs=[
                pl.BlockSpec((Tt, Bp, LANE), lambda c: (c, 0, 0)),  # px chunk
                pl.BlockSpec((LANE, LANE), lambda c: (0, 0)),       # Wh, resident
                pl.BlockSpec((1, LANE), lambda c: (0, 0)),          # mask, resident
                pl.BlockSpec((Bp, LANE), lambda c: (0, 0)),         # h0, read once
            ],
            out_specs=(
                pl.BlockSpec((Tt, Bp, LANE), lambda c: (c, 0, 0)),  # per-chunk output slab
                pl.BlockSpec((Bp, LANE), lambda c: (0, 0)),         # hidden carry (resident)
            ),
        ),
        compiler_params=pltpu.CompilerParams(
            # The recurrence is serial: do NOT split the time axis across cores.
            dimension_semantics=("arbitrary",),
        ),
    )(px, wh, mask, h0_p)

    # The slab intentionally contains junk outside lanes [H, H+O); slice here.
    log_probs = out_p[:T, :B, H:H + O]
    h_final = hlast_p[:B, :H]
    return log_probs, h_final


def rnn_step(x, h, wx, wh, b, *, hidden_size, output_size):
    """Single-step forward with the original module's (output, hidden) contract."""
    out, h_new = rnn_forward_seq(x[None], h, wx, wh, b,
                                 hidden_size=hidden_size, output_size=output_size)
    return out[0], h_new


def init_params(key, input_size, hidden_size, output_size):
    """Deterministic nn.Linear-style init: U(-1/sqrt(fan_in), 1/sqrt(fan_in))."""
    fan_in = input_size + hidden_size
    bound = 1.0 / math.sqrt(fan_in)
    k1, k2, k3, k4 = jax.random.split(key, 4)
    # Stored as (in_features, out_features) — transpose of PyTorch layout.
    w_ih = jax.random.uniform(k1, (fan_in, hidden_size), jnp.float32, -bound, bound)
    b_ih = jax.random.uniform(k2, (hidden_size,), jnp.float32, -bound, bound)
    w_io = jax.random.uniform(k3, (fan_in, output_size), jnp.float32, -bound, bound)
    b_io = jax.random.uniform(k4, (output_size,), jnp.float32, -bound, bound)
    return w_ih, b_ih, w_io, b_io


def pack_params(w_ih, b_ih, w_io, b_io):
    """Fuse i2h/i2o into one lane-padded weight and split input/hidden halves.

    Wh rows >= H must remain exactly zero (hidden-carry correctness relies on it).
    """
    fan_in, H = w_ih.shape
    O = w_io.shape[1]
    I = fan_in - H
    assert H + O <= LANE and H <= LANE, "toy packing assumes H+O <= 128"
    w = jnp.concatenate([w_ih, w_io], axis=1)            # (I+H, H+O)
    w = jnp.pad(w, ((0, 0), (0, LANE - (H + O))))        # lane-pad columns to 128
    wx = w[:I]                                           # (I, LANE)
    wh = jnp.pad(w[I:], ((0, LANE - H), (0, 0)))         # (LANE, LANE); rows >= H zero
    b = jnp.concatenate([b_ih, b_io])[None, :]
    b = jnp.pad(b, ((0, 0), (0, LANE - (H + O))))        # (1, LANE)
    return wx, wh, b


if __name__ == "__main__":
    input_size, hidden_size, output_size = 16, 32, 8
    batch, seq_len = 2, 8

    key = jax.random.PRNGKey(0)
    k_x, k_p = jax.random.split(key)

    xs = jax.random.normal(k_x, (seq_len, batch, input_size), jnp.float32)
    h0 = jnp.zeros((batch, hidden_size), jnp.float32)   # initHidden, broadcast to batch

    w_ih, b_ih, w_io, b_io = init_params(k_p, input_size, hidden_size, output_size)
    wx, wh, b = pack_params(w_ih, b_ih, w_io, b_io)

    # Pure-JAX reference: the original per-step forward (concat + 2 Linears + log-softmax).
    def ref_step(h, x):
        combined = jnp.concatenate([x, h], axis=-1)
        h_new = jnp.dot(combined, w_ih, precision=lax.Precision.HIGHEST) + b_ih
        logits = jnp.dot(combined, w_io, precision=lax.Precision.HIGHEST) + b_io
        out = jax.nn.log_softmax(logits, axis=-1)
        return h_new, (out, h_new)

    h_final_ref, (ref_out_seq, ref_h_seq) = lax.scan(ref_step, h0, xs)

    # Multi-chunk path (T % Tt == 0): 2 grid steps x 4 timesteps each.
    log_probs, h_final = rnn_forward_seq(
        xs, h0, wx, wh, b,
        hidden_size=hidden_size, output_size=output_size, time_chunk=4)
    jax.block_until_ready((log_probs, h_final))
    assert log_probs.shape == (seq_len, batch, output_size)
    assert h_final.shape == (batch, hidden_size)
    assert jnp.allclose(log_probs, ref_out_seq, atol=1e-3), "sequence output mismatch"
    assert jnp.allclose(h_final, h_final_ref, atol=1e-3), "final hidden mismatch"

    # Ragged-tail path (T % Tt != 0): exercises the padded-timestep guard.
    log_probs3, h_final3 = rnn_forward_seq(
        xs, h0, wx, wh, b,
        hidden_size=hidden_size, output_size=output_size, time_chunk=3)
    jax.block_until_ready((log_probs3, h_final3))
    assert jnp.allclose(log_probs3, ref_out_seq, atol=1e-3), "tail-chunk output mismatch"
    assert jnp.allclose(h_final3, h_final_ref, atol=1e-3), "tail-chunk hidden mismatch"

    # Single-step check (matches the original module's forward signature).
    step_out, step_h = rnn_step(xs[0], h0, wx, wh, b,
                                hidden_size=hidden_size, output_size=output_size)
    assert jnp.allclose(step_out, ref_out_seq[0], atol=1e-3), "single-step output mismatch"
    assert jnp.allclose(step_h, ref_h_seq[0], atol=1e-3), "single-step hidden mismatch"

    print("KERNEL_OK")
</pallas_src>

<mosaic_0001>
module attributes {stable_mosaic.version = 11 : i64} {
  func.func @_proj_kernel(%arg0: i32, %arg1: memref<32x16xf32, #tpu.memory_space<vmem>>, %arg2: memref<16x128xf32, #tpu.memory_space<vmem>>, %arg3: memref<1x128xf32, #tpu.memory_space<vmem>>, %arg4: memref<32x128xf32, #tpu.memory_space<vmem>>) attributes {dimension_semantics = [#tpu.dimension_semantics<parallel>], iteration_bounds = array<i64: 2>, scalar_prefetch = 0 : i64, scratch_operands = 0 : i64, tpu.core_type = #tpu.core_type<tc>, window_params = [{transform_indices = @transform_0, window_bounds = array<i64: 32, 16>}, {pipeline_mode = #tpu.pipeline_mode<synchronous>, transform_indices = @transform_1, window_bounds = array<i64: 16, 128>}, {pipeline_mode = #tpu.pipeline_mode<synchronous>, transform_indices = @transform_2, window_bounds = array<i64: 1, 128>}, {transform_indices = @transform_3, window_bounds = array<i64: 32, 128>}]} {
    %c0 = arith.constant 0 : index
    %c0_0 = arith.constant 0 : index
    %0 = vector.load %arg1[%c0, %c0_0] : memref<32x16xf32, #tpu.memory_space<vmem>>, vector<32x16xf32>
    %c0_1 = arith.constant 0 : index
    %c0_2 = arith.constant 0 : index
    %1 = vector.load %arg2[%c0_1, %c0_2] : memref<16x128xf32, #tpu.memory_space<vmem>>, vector<16x128xf32>
    %cst = arith.constant dense<0.000000e+00> : vector<32x128xf32>
    %2 = tpu.matmul %0, %1, %cst {dimension_numbers = #tpu.dot_dimension_numbers<[1], [0], [0], [1], [0, 0, 1, 1], [], []>} : vector<32x16xf32>, vector<16x128xf32>, vector<32x128xf32> -> vector<32x128xf32>
    %c0_3 = arith.constant 0 : index
    %c0_4 = arith.constant 0 : index
    %3 = vector.load %arg3[%c0_3, %c0_4] : memref<1x128xf32, #tpu.memory_space<vmem>>, vector<1x128xf32>
    %4 = vector.broadcast %3 : vector<1x128xf32> to vector<32x128xf32>
    %5 = arith.addf %2, %4 : vector<32x128xf32>
    %c0_5 = arith.constant 0 : index
    %c0_6 = arith.constant 0 : index
    %6 = vector.load %arg4[%c0_5, %c0_6] : memref<32x128xf32, #tpu.memory_space<vmem>>, vector<32x128xf32>
    tpu.vector_store %arg4[%c0_5, %c0_6], %5 {strides = array<i32>} : memref<32x128xf32, #tpu.memory_space<vmem>>, vector<32x128xf32>,
    return
  }
  func.func @transform_0(%arg0: i32) -> (i32, i32) {
    %c0_i32 = arith.constant 0 : i32
    %c0_i32_0 = arith.constant 0 : i32
    return %arg0, %c0_i32 : i32, i32
  }
  func.func @transform_1(%arg0: i32) -> (i32, i32) {
    %c0_i32 = arith.constant 0 : i32
    %c0_i32_0 = arith.constant 0 : i32
    %c0_i32_1 = arith.constant 0 : i32
    return %c0_i32, %c0_i32_0 : i32, i32
  }
  func.func @transform_2(%arg0: i32) -> (i32, i32) {
    %c0_i32 = arith.constant 0 : i32
    %c0_i32_0 = arith.constant 0 : i32
    %c0_i32_1 = arith.constant 0 : i32
    return %c0_i32, %c0_i32_0 : i32, i32
  }
  func.func @transform_3(%arg0: i32) -> (i32, i32) {
    %c0_i32 = arith.constant 0 : i32
    %c0_i32_0 = arith.constant 0 : i32
    return %arg0, %c0_i32 : i32, i32
  }
}

module attributes {stable_mosaic.version = 11 : i64} {
  func.func @kernel(%arg0: i32, %arg1: memref<4x8x128xf32, #tpu.memory_space<vmem>>, %arg2: memref<128x128xf32, #tpu.memory_space<vmem>>, %arg3: memref<1x128xf32, #tpu.memory_space<vmem>>, %arg4: memref<8x128xf32, #tpu.memory_space<vmem>>, %arg5: memref<4x8x128xf32, #tpu.memory_space<vmem>>, %arg6: memref<8x128xf32, #tpu.memory_space<vmem>>) attributes {dimension_semantics = [#tpu.dimension_semantics<arbitrary>], iteration_bounds = array<i64: 2>, scalar_prefetch = 0 : i64, scratch_operands = 0 : i64, tpu.core_type = #tpu.core_type<tc>, window_params = [{transform_indices = @transform_0, window_bounds = array<i64: 4, 8, 128>}, {pipeline_mode = #tpu.pipeline_mode<synchronous>, transform_indices = @transform_1, window_bounds = array<i64: 128, 128>}, {pipeline_mode = #tpu.pipeline_mode<synchronous>, transform_indices = @transform_2, window_bounds = array<i64: 1, 128>}, {pipeline_mode = #tpu.pipeline_mode<synchronous>, transform_indices = @transform_3, window_bounds = array<i64: 8, 128>}, {transform_indices = @transform_4, window_bounds = array<i64: 4, 8, 128>}, {pipeline_mode = #tpu.pipeline_mode<synchronous>, transform_indices = @transform_5, window_bounds = array<i64: 8, 128>}]} {
    %c0_i32 = arith.constant 0 : i32
    %0 = arith.cmpi eq, %arg0, %c0_i32 : i32
    %1 = arith.extui %0 : i1 to i32
    %c0_i32_0 = arith.constant 0 : i32
    %2 = arith.cmpi ne, %1, %c0_i32_0 : i32
    scf.if %2 {
      %c0_36 = arith.constant 0 : index
      %c0_37 = arith.constant 0 : index
      %95 = vector.load %arg4[%c0_36, %c0_37] : memref<8x128xf32, #tpu.memory_space<vmem>>, vector<8x128xf32>
      %c0_38 = arith.constant 0 : index
      %c0_39 = arith.constant 0 : index
      %96 = vector.load %arg6[%c0_38, %c0_39] : memref<8x128xf32, #tpu.memory_space<vmem>>, vector<8x128xf32>
      tpu.vector_store %arg6[%c0_38, %c0_39], %95 {strides = array<i32>} : memref<8x128xf32, #tpu.memory_space<vmem>>, vector<8x128xf32>,
    } else {
    }
    %c0 = arith.constant 0 : index
    %c0_1 = arith.constant 0 : index
    %3 = vector.load %arg2[%c0, %c0_1] : memref<128x128xf32, #tpu.memory_space<vmem>>, vector<128x128xf32>
    %c0_2 = arith.constant 0 : index
    %c0_3 = arith.constant 0 : index
    %4 = vector.load %arg3[%c0_2, %c0_3] : memref<1x128xf32, #tpu.memory_space<vmem>>, vector<1x128xf32>
    %c0_4 = arith.constant 0 : index
    %c0_5 = arith.constant 0 : index
    %5 = vector.load %arg6[%c0_4, %c0_5] : memref<8x128xf32, #tpu.memory_space<vmem>>, vector<8x128xf32>
    %c0_i32_6 = arith.constant 0 : i32
    %6 = arith.index_cast %c0_i32_6 : i32 to index
    %c0_7 = arith.constant 0 : index
    %c0_8 = arith.constant 0 : index
    %7 = vector.load %arg1[%6, %c0_7, %c0_8] : memref<4x8x128xf32, #tpu.memory_space<vmem>>, vector<1x8x128xf32>
    %8 = vector.shape_cast %7 : vector<1x8x128xf32> to vector<8x128xf32>
    %cst = arith.constant dense<0.000000e+00> : vector<8x128xf32>
    %9 = tpu.matmul %5, %3, %cst {dimension_numbers = #tpu.dot_dimension_numbers<[1], [0], [0], [1], [0, 0, 1, 1], [], []>} : vector<8x128xf32>, vector<128x128xf32>, vector<8x128xf32> -> vector<8x128xf32>
    %10 = arith.addf %8, %9 : vector<8x128xf32>
    %11 = vector.broadcast %4 : vector<1x128xf32> to vector<8x128xf32>
    %12 = arith.addf %10, %11 : vector<8x128xf32>
    %cst_9 = arith.constant dense<0xFF800000> : vector<8xf32>
    %13 = vector.multi_reduction <maximumf>, %12, %cst_9 [1] : vector<8x128xf32> to vector<8xf32>
    %14 = vector.shape_cast %13 : vector<8xf32> to vector<8x1xf32>
    %15 = vector.broadcast %14 : vector<8x1xf32> to vector<8x128xf32>
    %16 = arith.subf %12, %15 : vector<8x128xf32>
    %17 = math.exp %16 : vector<8x128xf32>
    %cst_10 = arith.constant dense<0.000000e+00> : vector<8xf32>
    %18 = vector.multi_reduction <add>, %17, %cst_10 [1] : vector<8x128xf32> to vector<8xf32>
    %19 = vector.shape_cast %18 : vector<8xf32> to vector<8x1xf32>
    %20 = math.log %19 : vector<8x1xf32>
    %21 = arith.addf %14, %20 : vector<8x1xf32>
    %22 = vector.broadcast %21 : vector<8x1xf32> to vector<8x128xf32>
    %23 = arith.subf %12, %22 : vector<8x128xf32>
    %24 = arith.index_cast %c0_i32_6 : i32 to index
    %c0_11 = arith.constant 0 : index
    %c0_12 = arith.constant 0 : index
    %25 = vector.load %arg5[%24, %c0_11, %c0_12] : memref<4x8x128xf32, #tpu.memory_space<vmem>>, vector<1x8x128xf32>
    %26 = vector.shape_cast %25 : vector<1x8x128xf32> to vector<8x128xf32>
    %27 = vector.shape_cast %23 : vector<8x128xf32> to vector<1x8x128xf32>
    tpu.vector_store %arg5[%24, %c0_11, %c0_12], %27 {strides = array<i32>} : memref<4x8x128xf32, #tpu.memory_space<vmem>>, vector<1x8x128xf32>,
    %c1_i32 = arith.constant 1 : i32
    %28 = arith.index_cast %c1_i32 : i32 to index
    %c0_13 = arith.constant 0 : index
    %c0_14 = arith.constant 0 : index
    %29 = vector.load %arg1[%28, %c0_13, %c0_14] : memref<4x8x128xf32, #tpu.memory_space<vmem>>, vector<1x8x128xf32>
    %30 = vector.shape_cast %29 : vector<1x8x128xf32> to vector<8x128xf32>
    %cst_15 = arith.constant dense<0.000000e+00> : vector<8x128xf32>
    %31 = tpu.matmul %10, %3, %cst_15 {dimension_numbers = #tpu.dot_dimension_numbers<[1], [0], [0], [1], [0, 0, 1, 1], [], []>} : vector<8x128xf32>, vector<128x128xf32>, vector<8x128xf32> -> vector<8x128xf32>
    %32 = arith.addf %30, %31 : vector<8x128xf32>
    %33 = vector.broadcast %4 : vector<1x128xf32> to vector<8x128xf32>
    %34 = arith.addf %32, %33 : vector<8x128xf32>
    %cst_16 = arith.constant dense<0xFF800000> : vector<8xf32>
    %35 = vector.multi_reduction <maximumf>, %34, %cst_16 [1] : vector<8x128xf32> to vector<8xf32>
    %36 = vector.shape_cast %35 : vector<8xf32> to vector<8x1xf32>
    %37 = vector.broadcast %36 : vector<8x1xf32> to vector<8x128xf32>
    %38 = arith.subf %34, %37 : vector<8x128xf32>
    %39 = math.exp %38 : vector<8x128xf32>
    %cst_17 = arith.constant dense<0.000000e+00> : vector<8xf32>
    %40 = vector.multi_reduction <add>, %39, %cst_17 [1] : vector<8x128xf32> to vector<8xf32>
    %41 = vector.shape_cast %40 : vector<8xf32> to vector<8x1xf32>
    %42 = math.log %41 : vector<8x1xf32>
    %43 = arith.addf %36, %42 : vector<8x1xf32>
    %44 = vector.broadcast %43 : vector<8x1xf32> to vector<8x128xf32>
    %45 = arith.subf %34, %44 : vector<8x128xf32>
    %46 = arith.index_cast %c1_i32 : i32 to index
    %c0_18 = arith.constant 0 : index
    %c0_19 = arith.constant 0 : index
    %47 = vector.load %arg5[%46, %c0_18, %c0_19] : memref<4x8x128xf32, #tpu.memory_space<vmem>>, vector<1x8x128xf32>
    %48 = vector.shape_cast %47 : vector<1x8x128xf32> to vector<8x128xf32>
    %49 = vector.shape_cast %45 : vector<8x128xf32> to vector<1x8x128xf32>
    tpu.vector_store %arg5[%46, %c0_18, %c0_19], %49 {strides = array<i32>} : memref<4x8x128xf32, #tpu.memory_space<vmem>>, vector<1x8x128xf32>,
    %c2_i32 = arith.constant 2 : i32
    %50 = arith.index_cast %c2_i32 : i32 to index
    %c0_20 = arith.constant 0 : index
    %c0_21 = arith.constant 0 : index
    %51 = vector.load %arg1[%50, %c0_20, %c0_21] : memref<4x8x128xf32, #tpu.memory_space<vmem>>, vector<1x8x128xf32>
    %52 = vector.shape_cast %51 : vector<1x8x128xf32> to vector<8x128xf32>
    %cst_22 = arith.constant dense<0.000000e+00> : vector<8x128xf32>
    %53 = tpu.matmul %32, %3, %cst_22 {dimension_numbers = #tpu.dot_dimension_numbers<[1], [0], [0], [1], [0, 0, 1, 1], [], []>} : vector<8x128xf32>, vector<128x128xf32>, vector<8x128xf32> -> vector<8x128xf32>
    %54 = arith.addf %52, %53 : vector<8x128xf32>
    %55 = vector.broadcast %4 : vector<1x128xf32> to vector<8x128xf32>
    %56 = arith.addf %54, %55 : vector<8x128xf32>
    %cst_23 = arith.constant dense<0xFF800000> : vector<8xf32>
    %57 = vector.multi_reduction <maximumf>, %56, %cst_23 [1] : vector<8x128xf32> to vector<8xf32>
    %58 = vector.shape_cast %57 : vector<8xf32> to vector<8x1xf32>
    %59 = vector.broadcast %58 : vector<8x1xf32> to vector<8x128xf32>
    %60 = arith.subf %56, %59 : vector<8x128xf32>
    %61 = math.exp %60 : vector<8x128xf32>
    %cst_24 = arith.constant dense<0.000000e+00> : vector<8xf32>
    %62 = vector.multi_reduction <add>, %61, %cst_24 [1] : vector<8x128xf32> to vector<8xf32>
    %63 = vector.shape_cast %62 : vector<8xf32> to vector<8x1xf32>
    %64 = math.log %63 : vector<8x1xf32>
    %65 = arith.addf %58, %64 : vector<8x1xf32>
    %66 = vector.broadcast %65 : vector<8x1xf32> to vector<8x128xf32>
    %67 = arith.subf %56, %66 : vector<8x128xf32>
    %68 = arith.index_cast %c2_i32 : i32 to index
    %c0_25 = arith.constant 0 : index
    %c0_26 = arith.constant 0 : index
    %69 = vector.load %arg5[%68, %c0_25, %c0_26] : memref<4x8x128xf32, #tpu.memory_space<vmem>>, vector<1x8x128xf32>
    %70 = vector.shape_cast %69 : vector<1x8x128xf32> to vector<8x128xf32>
    %71 = vector.shape_cast %67 : vector<8x128xf32> to vector<1x8x128xf32>
    tpu.vector_store %arg5[%68, %c0_25, %c0_26], %71 {strides = array<i32>} : memref<4x8x128xf32, #tpu.memory_space<vmem>>, vector<1x8x128xf32>,
    %c3_i32 = arith.constant 3 : i32
    %72 = arith.index_cast %c3_i32 : i32 to index
    %c0_27 = arith.constant 0 : index
    %c0_28 = arith.constant 0 : index
    %73 = vector.load %arg1[%72, %c0_27, %c0_28] : memref<4x8x128xf32, #tpu.memory_space<vmem>>, vector<1x8x128xf32>
    %74 = vector.shape_cast %73 : vector<1x8x128xf32> to vector<8x128xf32>
    %cst_29 = arith.constant dense<0.000000e+00> : vector<8x128xf32>
    %75 = tpu.matmul %54, %3, %cst_29 {dimension_numbers = #tpu.dot_dimension_numbers<[1], [0], [0], [1], [0, 0, 1, 1], [], []>} : vector<8x128xf32>, vector<128x128xf32>, vector<8x128xf32> -> vector<8x128xf32>
    %76 = arith.addf %74, %75 : vector<8x128xf32>
    %77 = vector.broadcast %4 : vector<1x128xf32> to vector<8x128xf32>
    %78 = arith.addf %76, %77 : vector<8x128xf32>
    %cst_30 = arith.constant dense<0xFF800000> : vector<8xf32>
    %79 = vector.multi_reduction <maximumf>, %78, %cst_30 [1] : vector<8x128xf32> to vector<8xf32>
    %80 = vector.shape_cast %79 : vector<8xf32> to vector<8x1xf32>
    %81 = vector.broadcast %80 : vector<8x1xf32> to vector<8x128xf32>
    %82 = arith.subf %78, %81 : vector<8x128xf32>
    %83 = math.exp %82 : vector<8x128xf32>
    %cst_31 = arith.constant dense<0.000000e+00> : vector<8xf32>
    %84 = vector.multi_reduction <add>, %83, %cst_31 [1] : vector<8x128xf32> to vector<8xf32>
    %85 = vector.shape_cast %84 : vector<8xf32> to vector<8x1xf32>
    %86 = math.log %85 : vector<8x1xf32>
    %87 = arith.addf %80, %86 : vector<8x1xf32>
    %88 = vector.broadcast %87 : vector<8x1xf32> to vector<8x128xf32>
    %89 = arith.subf %78, %88 : vector<8x128xf32>
    %90 = arith.index_cast %c3_i32 : i32 to index
    %c0_32 = arith.constant 0 : index
    %c0_33 = arith.constant 0 : index
    %91 = vector.load %arg5[%90, %c0_32, %c0_33] : memref<4x8x128xf32, #tpu.memory_space<vmem>>, vector<1x8x128xf32>
    %92 = vector.shape_cast %91 : vector<1x8x128xf32> to vector<8x128xf32>
    %93 = vector.shape_cast %89 : vector<8x128xf32> to vector<1x8x128xf32>
    tpu.vector_store %arg5[%90, %c0_32, %c0_33], %93 {strides = array<i32>} : memref<4x8x128xf32, #tpu.memory_space<vmem>>, vector<1x8x128xf32>,
    %c4_i32 = arith.constant 4 : i32
    %c0_34 = arith.constant 0 : index
    %c0_35 = arith.constant 0 : index
    %94 = vector.load %arg6[%c0_34, %c0_35] : memref<8x128xf32, #tpu.memory_space<vmem>>, vector<8x128xf32>
    tpu.vector_store %arg6[%c0_34, %c0_35], %76 {strides = array<i32>} : memref<8x128xf32, #tpu.memory_space<vmem>>, vector<8x128xf32>,
    return
  }
  func.func @transform_0(%arg0: i32) -> (i32, i32, i32) {
    %c0_i32 = arith.constant 0 : i32
    %c0_i32_0 = arith.constant 0 : i32
    %c0_i32_1 = arith.constant 0 : i32
    return %arg0, %c0_i32, %c0_i32_0 : i32, i32, i32
  }
  func.func @transform_1(%arg0: i32) -> (i32, i32) {
    %c0_i32 = arith.constant 0 : i32
    %c0_i32_0 = arith.constant 0 : i32
    %c0_i32_1 = arith.constant 0 : i32
    return %c0_i32, %c0_i32_0 : i32, i32
  }
  func.func @transform_2(%arg0: i32) -> (i32, i32) {
    %c0_i32 = arith.constant 0 : i32
    %c0_i32_0 = arith.constant 0 : i32
    %c0_i32_1 = arith.constant 0 : i32
    return %c0_i32, %c0_i32_0 : i32, i32
  }
  func.func @transform_3(%arg0: i32) -> (i32, i32) {
    %c0_i32 = arith.constant 0 : i32
    %c0_i32_0 = arith.constant 0 : i32
    %c0_i32_1 = arith.constant 0 : i32
    return %c0_i32, %c0_i32_0 : i32, i32
  }
  func.func @transform_4(%arg0: i32) -> (i32, i32, i32) {
    %c0_i32 = arith.constant 0 : i32
    %c0_i32_0 = arith.constant 0 : i32
    %c0_i32_1 = arith.constant 0 : i32
    return %arg0, %c0_i32, %c0_i32_0 : i32, i32, i32
  }
  func.func @transform_5(%arg0: i32) -> (i32, i32) {
    %c0_i32 = arith.constant 0 : i32
    %c0_i32_0 = arith.constant 0 : i32
    %c0_i32_1 = arith.constant 0 : i32
    return %c0_i32, %c0_i32_0 : i32, i32
  }
}

</mosaic_0001>

<bundles_post_ra>
// kernel: rnn_forward_seq.2
= control target key start
LH: loop header
LB: loop body
LE: loop exit
PB: predicated region body
PF: predicated region fallthrough
CT: control target
= control target key end

     0   :  { %8 = vsyncpa [#allocation3], 0  ;;  %s492_s12 = smov 0   ;;  %s533_s0 = inlined_call_operand.vmem [shape: f32[64,16], index: 0, kind: input, shape index: {}]   ;;  %s534_s1 = inlined_call_operand.hbm [shape: f32[16,128], index: 1, kind: input, shape index: {}]   ;;  %s535_s2 = inlined_call_operand.vmem [shape: f32[1,128], index: 2, kind: input, shape index: {}]   ;;  %s536_s3 = inlined_call_operand.vmem [shape: f32[64,128], index: 3, kind: output, shape index: {}]  }
   0x1 LB: > { %s372_s13 = sadd.s32 4294967295, %s467_s12   ;;  %p374_p0 = scmp.ge.s32.totalorder %s467_s12, 1  ;;  %s467_s12 = sphi %s492_s12, %s14_s12  }
   0x2   : > { %p113_p1 = scmp.lt.s32.totalorder %s467_s12, 3  ;;  %s469_s14 = smov [#allocation2]  }
   0x3   : > { %s125_s15 = sshll.u32 %s469_s14, 4  ;;  %p504_p3 = scmp.eq.s32.totalorder %s372_s13, 0  ;;  %s126_s15 = int_to_ptr.vmem [resolvable:$true] %s125_s15 }
   0x4   : > { %p500_p2 = pnand %p374_p0, %p113_p1  ;;  %s442_s18 = scalar_lea.vmem %s126_s15, 256 }
   0x5   : > { %p443_p7 = scmp.ne.s32.totalorder %s126_s15, %s442_s18  ;;  %p450_p10 = scmp.lt.s32.totalorder %s126_s15, %s126_s15 }
   0x6   : > { %p414_p4 = pneg %p500_p2  ;;  %p451_p11 = scmp.lt.s32.totalorder %s442_s18, %s442_s18 }
   0x8   : > { %p415_p5 = pnand %p504_p3, %p414_p4  ;;  %p452_p12 = por %p451_p11, %p450_p10 }
   0xa   : > { %p433_p6 = pneg %p415_p5 }
   0xc   : > { %p445_p8 = pnand %p443_p7, %p433_p6 }
   0xe   : > { %p446_p9 = pneg %p445_p8 }
  0x10   : > { %p453_p13 = pnand %p452_p12, %p446_p9 }
  0x12   : > { %456 = shalt.err (!%p453_p13)
}
  0x13   : > { %s470_s19 = smov 128   ;;  %s471_s20 = smov 8  }
  0x14   : > { %417 = dma.hbm_to_vmem [thread:$0]  (!%p415_p5), %s534_s1, 256, %s126_s15, [#allocation3], %s470_s19, %s470_s19, %s471_s20  }
  0x15   : > { %153 = sbr.rel (%p500_p2) target bundleno = 233 (0xe9), region = 32 }
  0x1a   : > { %462 = dma.done.wait (%p504_p3), [#allocation3], 256  }
  0x1b   : > { %464 = vsyncadd (%p504_p3), [#allocation3], 4294967040  ;;  %s379_s23 = sshll.u32 %s372_s13, 2  ;;  %v194_v0 = vld [vmem:[#allocation2 + $0x8] sm:$0xff]  ;;  %v193_v1 = vld [vmem:[#allocation2] sm:$0xff]  ;;  %vm202_vm0 = vcmask 130048  }
  0x1c   : > { %p178_p0 = scmp.lt.s32.totalorder %s379_s23, 7  ;;  %396 = vmatprep.subr.mxu0 %v194_v0  ;;  %406 = vmatprep.subr.mxu1 %v194_v0  ;;  %v383_v8 = vld [vmem:[%s535_s2] ss:$0 sm:$0xff] }
  0x1d   : > { %397 = vmatpush3.msra.mxu0 %v194_v0  ;;  %408 = vmatpush3.msra.mxu1 %v194_v0 }
  0x1e   : > { %s540_s23 = smov (!%p178_p0, %s379_s23), 7  ;;  %398 = vmatprep.subr.mxu0 %v193_v1  ;;  %407 = vmatprep.subr.mxu1 %v193_v1 }
  0x1f   : > { %s380_s24 = sshll.u32 %s540_s23, 3  ;;  %399 = vmatpush3.msra.mxu0 %v193_v1  ;;  %409 = vmatpush3.msra.mxu1 %v193_v1 }
  0x20   : > { %s181_s27 = scalar_lea.vmem %s533_s0, %s380_s24  ;;  %s187_s5 = scalar_lea.vmem %s536_s3, %s380_s24 }
  0x21   : > { %v189_v2 = vld [vmem:[%s181_s27] sm:$0xff]  ;;  %v191_v3 = vld [vmem:[%s181_s27 + $0x10] sm:$0xff]  ;;  %v190_v4 = vld [vmem:[%s181_s27 + $0x8] sm:$0xff] }
  0x22   : > { %v192_v5 = vld [vmem:[%s181_s27 + $0x18] sm:$0xff]  ;;  %400 = vmatprep.mubr.msk.f32.mxu0 %vm202_vm0, %v189_v2  ;;  %403 = vmatprep.mubr.msk.f32.mxu1 %vm202_vm0, %v191_v3 }
  0x23   : > { %401 = vmatmul.mubr.msk.f32.vlgmr.msra.gmra.mxu0 %vm202_vm0, %v190_v4  ;;  %404 = vmatmul.mubr.msk.f32.vlgmr.msra.gmra.mxu1 %vm202_vm0, %v192_v5 }
  0xe3   : > { %v402_v6 = vpop.f32.mrf.mxu0  ;;  %v405_v7 = vpop.f32.mrf.mxu1 }
  0xe4   : > { %v287_v12 = vadd.f32 %v402_v6, %v383_v8  ;;  %v297_v14 = vadd.f32 %v405_v7, %v383_v8 }
  0xe5   : > { %v281_v9 = vpop.f32.mrf.mxu0  ;;  %v291_v10 = vpop.f32.mrf.mxu1 }
  0xe6   : > { %v282_v11 = vadd.f32 %v383_v8, %v281_v9  ;;  %v292_v13 = vadd.f32 %v383_v8, %v291_v10  ;;  %301 = vst [vmem:[%s187_s5 + $0x8] sm:$0xff] %v287_v12  ;;  %303 = vst [vmem:[%s187_s5 + $0x18] sm:$0xff] %v297_v14 }
  0xe8   : > { %300 = vst [vmem:[%s187_s5] sm:$0xff] %v282_v11  ;;  %302 = vst [vmem:[%s187_s5 + $0x10] sm:$0xff] %v292_v13 }
  0xe9 PF: > { %s14_s12 = sadd.s32 1, %s467_s12  }
  0xea   : > { %p11_p1 = scmp.ge.s32.totalorder %s14_s12, 4  }
  0xec   :  { %13 = sbr.rel (!%p11_p1) target bundleno = 1 (0x1), region = 67 }
  0xf1   :  { %326 = vsyncpa [#allocation3], 1 }
  0xf2   :  { %328 = vsyncpa [#allocation3 + $0x1], 1 }

// kernel: rnn_forward_seq.3
= control target key start
LH: loop header
LB: loop body
LE: loop exit
PB: predicated region body
PF: predicated region fallthrough
CT: control target
= control target key end

     0   :  { %s958_s18 = smov 0   ;;  %s1224_s0 = inlined_call_operand.vmem [shape: f32[8,8,128], index: 0, kind: input, shape index: {}]   ;;  %s1225_s1 = inlined_call_operand.vmem [shape: f32[128,128], index: 1, kind: input, shape index: {}]   ;;  %s1226_s2 = inlined_call_operand.vmem [shape: f32[1,128], index: 2, kind: input, shape index: {}]   ;;  %s1227_s3 = inlined_call_operand.vmem [shape: f32[8,128], index: 3, kind: input, shape index: {}]   ;;  %s1228_s4 = inlined_call_operand.vmem [shape: f32[8,8,128], index: 4, kind: output, shape index: {0}]   ;;  %s1229_s5 = inlined_call_operand.vmem [shape: f32[8,128], index: 5, kind: output, shape index: {1}]  }
   0x1 LB: > { %s665_s19 = sadd.s32 4294967295, %s924_s18   ;;  %p669_p0 = scmp.ge.s32.totalorder %s924_s18, 1  ;;  %s924_s18 = sphi %s958_s18, %s16_s18  }
   0x2   : > { %p186_p1 = scmp.lt.s32.totalorder %s924_s18, 3 }
   0x4   : > { %p187_p2 = pnand %p669_p0, %p186_p1 }
   0x5   : > { %s670_s20 = sshll.u32 (!%p187_p2), %s665_s19, 2  ;;  %p674_p4 = scmp.ne.s32.totalorder (!%p187_p2), %s665_s19, 0 }
   0x6   : > { %190 = sbr.rel (%p187_p2) target bundleno = 1148 (0x47c), region = 36  ;;  %p215_p3 = scmp.lt.s32.totalorder (!%p187_p2), %s670_s20, 7 }
   0xb   : > { %s1231_s20 = smov (!%p215_p3, %s670_s20), 7  ;;  %229 = sbr.rel (%p674_p4) target bundleno = 18 (0x12), region = 40 }
   0xc   : > { %s671_s21 = sshll.u32 %s1231_s20, 3 }
   0xd   : > { %s969_s24 = scalar_lea.vmem %s1224_s0, %s671_s21  ;;  %s974_s27 = scalar_lea.vmem %s1228_s4, %s671_s21 }
  0x10   : > { %v230_v0 = vld [vmem:[%s1227_s3] sm:$0xff] }
  0x11   : > { %231 = vst [vmem:[%s1229_s5] sm:$0xff] %v230_v0 }
  0x12 PF: > { %v985_v1 = vld [vmem:[%s1225_s1 + $0x78] sm:$0xff]  ;;  %v926_v2 = vmov 0.0   ;;  %v991_v3 = vld [vmem:[%s1225_s1 + $0x70] sm:$0xff]  ;;  %vm927_vm0 = vmmov 0   ;;  %v1001_v4 = vld [vmem:[%s1225_s1 + $0x68] sm:$0xff] }
  0x13   : > { %752 = vmatprep.subr.mxu0 %v926_v2  ;;  %784 = vmatprep.mubr.msk.f32.mxu0 %vm927_vm0, %v926_v2  ;;  %v1010_v5 = vld [vmem:[%s1225_s1 + $0x60] sm:$0xff]  ;;  %v1019_v6 = vld [vmem:[%s1225_s1 + $0x58] sm:$0xff]  ;;  %v1028_v7 = vld [vmem:[%s1225_s1 + $0x50] sm:$0xff] }
  0x14   : > { %753 = vmatpush3.msra.mxu0 %v985_v1  ;;  %787 = vmatprep.subr.mxu1 %v926_v2  ;;  %v1037_v8 = vld [vmem:[%s1225_s1 + $0x48] sm:$0xff]  ;;  %v1046_v9 = vld [vmem:[%s1225_s1 + $0x40] sm:$0xff]  ;;  %v1055_v10 = vld [vmem:[%s1225_s1 + $0x38] sm:$0xff] }
  0x15   : > { %754 = vmatprep.subr.mxu0 %v926_v2  ;;  %788 = vmatpush3.msra.mxu1 %v985_v1  ;;  %v1064_v11 = vld [vmem:[%s1225_s1 + $0x30] sm:$0xff]  ;;  %v1073_v12 = vld [vmem:[%s1225_s1 + $0x28] sm:$0xff]  ;;  %v1082_v13 = vld [vmem:[%s1225_s1 + $0x20] sm:$0xff] }
  0x16   : > { %755 = vmatpush3.msra.mxu0 %v991_v3  ;;  %789 = vmatprep.subr.mxu1 %v926_v2  ;;  %v1091_v14 = vld [vmem:[%s1225_s1 + $0x18] sm:$0xff]  ;;  %v1100_v15 = vld [vmem:[%s1225_s1 + $0x10] sm:$0xff]  ;;  %v1109_v16 = vld [vmem:[%s1225_s1 + $0x8] sm:$0xff] }
  0x17   : > { %756 = vmatprep.subr.mxu0 %v926_v2  ;;  %790 = vmatpush3.msra.mxu1 %v991_v3  ;;  %v1118_v17 = vld [vmem:[%s1225_s1] sm:$0xff]  ;;  %v676_v28 = vld [vmem:[%s969_s24 + $0x8] sm:$0xff]  ;;  %v678_v40 = vld [vmem:[%s969_s24 + $0x10] sm:$0xff] }
  0x18   : > { %757 = vmatpush3.msra.mxu0 %v1001_v4  ;;  %791 = vmatprep.subr.mxu1 %v926_v2  ;;  %v249_v18 = vld [vmem:[%s1229_s5] sm:$0xff]  ;;  %v680_v51 = vld [vmem:[%s969_s24 + $0x18] sm:$0xff] }
  0x19   : > { %758 = vmatprep.subr.mxu0 %v926_v2  ;;  %792 = vmatpush3.msra.mxu1 %v1001_v4  ;;  %v250_v19 = vld [vmem:[%s969_s24] sm:$0xff] }
  0x1a   : > { %759 = vmatpush3.msra.mxu0 %v1010_v5  ;;  %793 = vmatprep.subr.mxu1 %v926_v2  ;;  %v1172_v20 = vld [vmem:[%s1226_s2] ss:$0 sm:$0xff] }
  0x1b   : > { %760 = vmatprep.subr.mxu0 %v926_v2  ;;  %794 = vmatpush3.msra.mxu1 %v1010_v5 }
  0x1c   : > { %761 = vmatpush3.msra.mxu0 %v1019_v6  ;;  %795 = vmatprep.subr.mxu1 %v926_v2 }
  0x1d   : > { %762 = vmatprep.subr.mxu0 %v926_v2  ;;  %796 = vmatpush3.msra.mxu1 %v1019_v6 }
  0x1e   : > { %763 = vmatpush3.msra.mxu0 %v1028_v7  ;;  %797 = vmatprep.subr.mxu1 %v926_v2 }
  0x1f   : > { %764 = vmatprep.subr.mxu0 %v926_v2  ;;  %798 = vmatpush3.msra.mxu1 %v1028_v7 }
  0x20   : > { %765 = vmatpush3.msra.mxu0 %v1037_v8  ;;  %799 = vmatprep.subr.mxu1 %v926_v2 }
  0x21   : > { %766 = vmatprep.subr.mxu0 %v926_v2  ;;  %800 = vmatpush3.msra.mxu1 %v1037_v8 }
  0x22   : > { %767 = vmatpush3.msra.mxu0 %v1046_v9  ;;  %801 = vmatprep.subr.mxu1 %v926_v2 }
  0x23   : > { %768 = vmatprep.subr.mxu0 %v926_v2  ;;  %802 = vmatpush3.msra.mxu1 %v1046_v9 }
  0x24   : > { %769 = vmatpush3.msra.mxu0 %v1055_v10  ;;  %803 = vmatprep.subr.mxu1 %v926_v2 }
  0x25   : > { %770 = vmatprep.subr.mxu0 %v926_v2  ;;  %804 = vmatpush3.msra.mxu1 %v1055_v10 }
  0x26   : > { %771 = vmatpush3.msra.mxu0 %v1064_v11  ;;  %805 = vmatprep.subr.mxu1 %v926_v2 }
  0x27   : > { %772 = vmatprep.subr.mxu0 %v926_v2  ;;  %806 = vmatpush3.msra.mxu1 %v1064_v11 }
  0x28   : > { %773 = vmatpush3.msra.mxu0 %v1073_v12  ;;  %807 = vmatprep.subr.mxu1 %v926_v2 }
  0x29   : > { %774 = vmatprep.subr.mxu0 %v926_v2  ;;  %808 = vmatpush3.msra.mxu1 %v1073_v12 }
  0x2a   : > { %775 = vmatpush3.msra.mxu0 %v1082_v13  ;;  %809 = vmatprep.subr.mxu1 %v926_v2 }
  0x2b   : > { %776 = vmatprep.subr.mxu0 %v926_v2  ;;  %810 = vmatpush3.msra.mxu1 %v1082_v13 }
  0x2c   : > { %777 = vmatpush3.msra.mxu0 %v1091_v14  ;;  %811 = vmatprep.subr.mxu1 %v926_v2 }
  0x2d   : > { %778 = vmatprep.subr.mxu0 %v926_v2  ;;  %812 = vmatpush3.msra.mxu1 %v1091_v14 }
  0x2e   : > { %779 = vmatpush3.msra.mxu0 %v1100_v15  ;;  %813 = vmatprep.subr.mxu1 %v926_v2 }
  0x2f   : > { %780 = vmatprep.subr.mxu0 %v926_v2  ;;  %814 = vmatpush3.msra.mxu1 %v1100_v15 }
  0x30   : > { %781 = vmatpush3.msra.mxu0 %v1109_v16  ;;  %815 = vmatprep.subr.mxu1 %v926_v2 }
  0x31   : > { %782 = vmatprep.subr.mxu0 %v926_v2  ;;  %816 = vmatpush3.msra.mxu1 %v1109_v16 }
  0x32   : > { %783 = vmatpush3.msra.mxu0 %v1118_v17  ;;  %817 = vmatprep.subr.mxu1 %v926_v2 }
  0x33   : > { %785 = vmatmul.mubr.f32.vlgmr.msra.gmra.mxu0 %v249_v18  ;;  %818 = vmatpush3.msra.mxu1 %v1118_v17 }
  0x34   : > { %819 = vmatprep.mubr.msk.f32.mxu1 %vm927_vm0, %v926_v2  ;;  %822 = vmatprep.subr.mxu0 %v926_v2 }
  0x35   : > { %823 = vmatpush3.msra.mxu0 %v985_v1  ;;  %854 = vmatprep.mubr.msk.f32.mxu0 %vm927_vm0, %v926_v2 }
  0x36   : > { %824 = vmatprep.subr.mxu0 %v926_v2  ;;  %857 = vmatprep.subr.mxu1 %v926_v2 }
  0x37   : > { %825 = vmatpush3.msra.mxu0 %v991_v3 }
  0x38   : > { %826 = vmatprep.subr.mxu0 %v926_v2 }
  0x39   : > { %827 = vmatpush3.msra.mxu0 %v1001_v4 }
  0x3a   : > { %828 = vmatprep.subr.mxu0 %v926_v2 }
  0x3b   : > { %829 = vmatpush3.msra.mxu0 %v1010_v5 }
  0x3c   : > { %830 = vmatprep.subr.mxu0 %v926_v2 }
  0x3d   : > { %831 = vmatpush3.msra.mxu0 %v1019_v6 }
  0x3e   : > { %832 = vmatprep.subr.mxu0 %v926_v2 }
  0x3f   : > { %833 = vmatpush3.msra.mxu0 %v1028_v7 }
  0x40   : > { %834 = vmatprep.subr.mxu0 %v926_v2 }
  0x41   : > { %835 = vmatpush3.msra.mxu0 %v1037_v8 }
  0x42   : > { %836 = vmatprep.subr.mxu0 %v926_v2 }
  0x43   : > { %837 = vmatpush3.msra.mxu0 %v1046_v9 }
  0x44   : > { %838 = vmatprep.subr.mxu0 %v926_v2 }
  0x45   : > { %839 = vmatpush3.msra.mxu0 %v1055_v10 }
  0x46   : > { %840 = vmatprep.subr.mxu0 %v926_v2 }
  0x47   : > { %841 = vmatpush3.msra.mxu0 %v1064_v11 }
  0x48   : > { %842 = vmatprep.subr.mxu0 %v926_v2 }
  0x49   : > { %843 = vmatpush3.msra.mxu0 %v1073_v12 }
  0x4a   : > { %844 = vmatprep.subr.mxu0 %v926_v2 }
  0x4b   : > { %845 = vmatpush3.msra.mxu0 %v1082_v13 }
  0x4c   : > { %846 = vmatprep.subr.mxu0 %v926_v2 }
  0x4d   : > { %847 = vmatpush3.msra.mxu0 %v1091_v14 }
  0x4e   : > { %848 = vmatprep.subr.mxu0 %v926_v2 }
  0x4f   : > { %849 = vmatpush3.msra.mxu0 %v1100_v15 }
  0x50   : > { %850 = vmatprep.subr.mxu0 %v926_v2 }
  0x51   : > { %851 = vmatpush3.msra.mxu0 %v1109_v16 }
  0x52   : > { %852 = vmatprep.subr.mxu0 %v926_v2 }
  0x53   : > { %853 = vmatpush3.msra.mxu0 %v1118_v17 }
  0xf3   : > { %v317_v21 = vpop.f32.mrf.mxu0 }
  0xf4   : > { %v321_v22 = vadd.f32 %v317_v21, %v250_v19 }
  0xf5   : > { %v786_v23 = vpop.f32.mrf.mxu0 }
  0xf6   : > { %v328_v24 = vadd.f32 %v1172_v20, %v321_v22  ;;  %820 = vmatmul.mubr.f32.vlgmr.msra.gmra.mxu1 %v321_v22 }
  0xf7   : > { %858 = vmatpush3.msra.mxu1 %v985_v1  ;;  %889 = vmatprep.mubr.msk.f32.mxu1 %vm927_vm0, %v926_v2 }
  0xf8   : > { %329 = vmax.xlane.f32.xlu0 %v328_v24  ;;  %859 = vmatprep.subr.mxu1 %v926_v2 }
  0xf9   : > { %860 = vmatpush3.msra.mxu1 %v991_v3 }
  0xfa   : > { %861 = vmatprep.subr.mxu1 %v926_v2 }
  0xfb   : > { %862 = vmatpush3.msra.mxu1 %v1001_v4 }
  0xfc   : > { %863 = vmatprep.subr.mxu1 %v926_v2 }
  0xfd   : > { %864 = vmatpush3.msra.mxu1 %v1010_v5 }
  0xfe   : > { %865 = vmatprep.subr.mxu1 %v926_v2 }
  0xff   : > { %866 = vmatpush3.msra.mxu1 %v1019_v6 }
 0x100   : > { %867 = vmatprep.subr.mxu1 %v926_v2 }
 0x101   : > { %868 = vmatpush3.msra.mxu1 %v1028_v7 }
 0x102   : > { %869 = vmatprep.subr.mxu1 %v926_v2 }
 0x103   : > { %870 = vmatpush3.msra.mxu1 %v1037_v8 }
 0x104   : > { %871 = vmatprep.subr.mxu1 %v926_v2 }
 0x105   : > { %872 = vmatpush3.msra.mxu1 %v1046_v9 }
 0x106   : > { %873 = vmatprep.subr.mxu1 %v926_v2 }
 0x107   : > { %874 = vmatpush3.msra.mxu1 %v1055_v10 }
 0x108   : > { %875 = vmatprep.subr.mxu1 %v926_v2 }
 0x109   : > { %876 = vmatpush3.msra.mxu1 %v1064_v11 }
 0x10a   : > { %877 = vmatprep.subr.mxu1 %v926_v2 }
 0x10b   : > { %878 = vmatpush3.msra.mxu1 %v1073_v12 }
 0x10c   : > { %879 = vmatprep.subr.mxu1 %v926_v2 }
 0x10d   : > { %880 = vmatpush3.msra.mxu1 %v1082_v13 }
 0x10e   : > { %881 = vmatprep.subr.mxu1 %v926_v2 }
 0x10f   : > { %882 = vmatpush3.msra.mxu1 %v1091_v14 }
 0x110   : > { %883 = vmatprep.subr.mxu1 %v926_v2 }
 0x111   : > { %884 = vmatpush3.msra.mxu1 %v1100_v15 }
 0x112   : > { %885 = vmatprep.subr.mxu1 %v926_v2 }
 0x113   : > { %886 = vmatpush3.msra.mxu1 %v1109_v16 }
 0x114   : > { %887 = vmatprep.subr.mxu1 %v926_v2 }
 0x115   : > { %888 = vmatpush3.msra.mxu1 %v1118_v17 }
 0x181   : > { %v330_v25 = vpop.xlane.xlu0 %329 }
 0x182   : > { %v331_v26 = vsub.f32 %v328_v24, %v330_v25 }
 0x184   : > { %v332_v27 = vmul.f32 1.442695, %v331_v26 }
 0x186   : > { %902 = vpow2.f32 %v332_v27 }
 0x193   : > { %v903_v33 = vpop.eup %902 }
 0x1b6   : > { %v409_v29 = vpop.f32.mrf.mxu1 }
 0x1b7   : > { %v413_v30 = vadd.f32 %v676_v28, %v409_v29 }
 0x1b8   : > { %v821_v31 = vpop.f32.mrf.mxu1 }
 0x1b9   : > { %v414_v32 = vadd.f32 %v1172_v20, %v413_v30  ;;  %855 = vmatmul.mubr.f32.vlgmr.msra.gmra.mxu0 %v413_v30 }
 0x1bb   : > { %415 = vmax.xlane.f32.xlu0 %v414_v32 }
 0x1bf   : > { %334 = vadd.xlane.f32.xlu0 %v903_v33 }
 0x244   : > { %v416_v34 = vpop.xlane.xlu0 %415 }
 0x245   : > { %v417_v49 = vsub.f32 %v414_v32, %v416_v34 }
 0x247   : > { %v418_v50 = vmul.f32 1.442695, %v417_v49 }
 0x248   : > { %v335_v35 = vpop.xlane.xlu0 %334 }
 0x249   : > { %904 = vlog2.f32 %v335_v35 }
 0x256   : > { %v905_v36 = vpop.eup %904 }
 0x257   : > { %v337_v37 = vmul.f32 0.6931472, %v905_v36 }
 0x259   : > { %v338_v38 = vadd.f32 %v337_v37, %v330_v25 }
 0x25b   : > { %v339_v39 = vsub.f32 %v328_v24, %v338_v38 }
 0x25d   : > { %340 = vst [vmem:[%s974_s27] sm:$0xff] %v339_v39 }
 0x279   : > { %v496_v41 = vpop.f32.mrf.mxu0 }
 0x27a   : > { %v500_v42 = vadd.f32 %v678_v40, %v496_v41 }
 0x27b   : > { %v856_v43 = vpop.f32.mrf.mxu0 }
 0x27c   : > { %v501_v44 = vadd.f32 %v1172_v20, %v500_v42  ;;  %890 = vmatmul.mubr.f32.vlgmr.msra.gmra.mxu1 %v500_v42 }
 0x27e   : > { %502 = vmax.xlane.f32.xlu1 %v501_v44 }
 0x307   : > { %v503_v45 = vpop.xlane.xlu1 %502 }
 0x308   : > { %v504_v46 = vsub.f32 %v501_v44, %v503_v45 }
 0x30a   : > { %v505_v47 = vmul.f32 1.442695, %v504_v46 }
 0x30c   : > { %906 = vpow2.f32 %v505_v47 }
 0x30d   : > { %908 = vpow2.f32 %v418_v50 }
 0x319   : > { %v907_v48 = vpop.eup %906 }
 0x31a   : > { %507 = vadd.xlane.f32.xlu0 %v907_v48  ;;  %v909_v56 = vpop.eup %908 }
 0x33c   : > { %v583_v52 = vpop.f32.mrf.mxu1 }
 0x33d   : > { %v587_v53 = vadd.f32 %v680_v51, %v583_v52 }
 0x33e   : > { %v891_v54 = vpop.f32.mrf.mxu1 }
 0x33f   : > { %v588_v55 = vadd.f32 %v1172_v20, %v587_v53  ;;  %602 = vst [vmem:[%s1229_s5] sm:$0xff] %v587_v53 }
 0x341   : > { %589 = vmax.xlane.f32.xlu1 %v588_v55 }
 0x345   : > { %420 = vadd.xlane.f32.xlu1 %v909_v56 }
 0x3a3   : > { %v508_v57 = vpop.xlane.xlu0 %507 }
 0x3a4   : > { %910 = vlog2.f32 %v508_v57 }
 0x3b1   : > { %v911_v62 = vpop.eup %910 }
 0x3b2   : > { %v510_v63 = vmul.f32 0.6931472, %v911_v62 }
 0x3b4   : > { %v511_v3 = vadd.f32 %v510_v63, %v503_v45 }
 0x3b6   : > { %v512_v6 = vsub.f32 %v501_v44, %v511_v3 }
 0x3b8   : > { %679 = vst [vmem:[%s974_s27 + $0x10] sm:$0xff] %v512_v6 }
 0x3ca   : > { %v590_v58 = vpop.xlane.xlu1 %589 }
 0x3cb   : > { %v591_v59 = vsub.f32 %v588_v55, %v590_v58 }
 0x3cd   : > { %v592_v60 = vmul.f32 1.442695, %v591_v59 }
 0x3ce   : > { %v421_v61 = vpop.xlane.xlu1 %420 }
 0x3cf   : > { %912 = vpow2.f32 %v592_v60 }
 0x3d0   : > { %914 = vlog2.f32 %v421_v61 }
 0x3dc   : > { %v913_v0 = vpop.eup %912 }
 0x3dd   : > { %v915_v1 = vpop.eup %914  ;;  %594 = vadd.xlane.f32.xlu1 %v913_v0 }
 0x3de   : > { %v423_v2 = vmul.f32 0.6931472, %v915_v1 }
 0x3e0   : > { %v424_v4 = vadd.f32 %v423_v2, %v416_v34 }
 0x3e2   : > { %v425_v5 = vsub.f32 %v414_v32, %v424_v4 }
 0x3e4   : > { %677 = vst [vmem:[%s974_s27 + $0x8] sm:$0xff] %v425_v5 }
 0x466   : > { %v595_v7 = vpop.xlane.xlu1 %594 }
 0x467   : > { %916 = vlog2.f32 %v595_v7 }
 0x474   : > { %v917_v8 = vpop.eup %916 }
 0x475   : > { %v597_v9 = vmul.f32 0.6931472, %v917_v8 }
 0x477   : > { %v598_v10 = vadd.f32 %v597_v9, %v590_v58 }
 0x479   : > { %v599_v11 = vsub.f32 %v588_v55, %v598_v10 }
 0x47b   : > { %681 = vst [vmem:[%s974_s27 + $0x18] sm:$0xff] %v599_v11 }
 0x47c PF: > { %s16_s18 = sadd.s32 1, %s924_s18  }
 0x47d   : > { %p13_p5 = scmp.ge.s32.totalorder %s16_s18, 4  }
 0x47f   :  { %15 = sbr.rel (!%p13_p5) target bundleno = 1 (0x1), region = 84 }

</bundles_post_ra>
